<compile_context>
chip_gen: v7x
topology: tpu7x:2x2x1
jax: 0.10.0
libtpu: 0.0.40
codegen_flags: <defaults>
</compile_context>

<pallas_src>
import functools

import jax
import jax.numpy as jnp
from jax.experimental import pallas as pl
from jax.experimental.pallas import tpu as pltpu


def ar_kernel(x_ref, w_ref, b_ref, o_ref, *, window, d):
    # x_ref: (TB, window*d) VMEM -- lane-dense slab of TB batch rows
    # w_ref: (window,)      SMEM -- linear weight scalars
    # b_ref: (1,)           SMEM -- linear bias scalar
    # o_ref: (TB, d)        VMEM
    # Unrolled weighted accumulation over window positions (static lane
    # slices of the flat row; each is a cheap VPU scalar*vector + add).
    acc = x_ref[:, 0:d].astype(jnp.float32) * w_ref[0]
    for w in range(1, window):
        acc = acc + x_ref[:, w * d:(w + 1) * d].astype(jnp.float32) * w_ref[w]
    o_ref[...] = (acc + b_ref[0]).astype(o_ref.dtype)


def _num_tensorcores():
    # Only v7x (2 TCs/chip) benefits from splitting the grid; v5e/v6e have 1.
    try:
        kind = jax.devices()[0].device_kind.lower()
        if "v7" in kind:
            return 2
    except Exception:
        pass
    return 1


def _physical_vmem_bytes():
    try:
        return int(pltpu.get_tpu_info().vmem_capacity_bytes)
    except Exception:
        return 64 * 1024 * 1024  # conservative (v7x per-TC VMEM)


def ar_forward(x, weight, bias, *, tb=None):
    """x: [B, W, D], weight: [1, W], bias: [1]  ->  [B, 1, D]."""
    B, W, D = x.shape
    itemsize = x.dtype.itemsize
    sublane_mult = 8 * max(1, 4 // itemsize)  # 8 for f32, 16 for bf16

    # Lane-dense view of x: free reshape of the contiguous [B, W, D] array.
    x2 = x.reshape(B, W * D)

    phys_vmem = _physical_vmem_bytes()
    cores = _num_tensorcores()

    row_bytes = pl.cdiv(W * D, 128) * 128 * itemsize       # lane-padded input row
    out_row_bytes = pl.cdiv(D, 128) * 128 * itemsize        # lane-padded output row

    if tb is None:
        # ~8 MiB per input buffer (double-buffered) amortizes the ~0.35 us
        # per-step overhead to <10% on all of v5e/v6e/v7x.
        budget = min(8 << 20, phys_vmem // 8)
        tb = max(1, min(B, budget // row_bytes))
        if cores > 1 and B >= cores:
            # v7x: split into a step count that is a multiple of the TC count
            # so both TensorCores get (nearly) equal work.
            steps = pl.cdiv(B, tb)
            steps = pl.cdiv(max(steps, cores), cores) * cores
            tb = pl.cdiv(B, steps)

    # (8,128) block constraint: the second-to-last block dim must be a
    # multiple of the sublane tile or span the full array extent.
    if tb < B:
        tb = min(B, pl.cdiv(tb, sublane_mult) * sublane_mult)
    tb = max(1, min(tb, B))

    grid_steps = pl.cdiv(B, tb)

    slab_rows = pl.cdiv(tb, sublane_mult) * sublane_mult
    slab_bytes = slab_rows * row_bytes
    out_slab_bytes = slab_rows * out_row_bytes
    need = 2 * slab_bytes + 2 * out_slab_bytes + (4 << 20)   # double buffers + headroom
    vmem_limit = int(min(max(32 << 20, need), max(32 << 20, phys_vmem // 2)))

    w_smem = weight.reshape(W).astype(jnp.float32)
    b_smem = bias.reshape(1).astype(jnp.float32)

    cost = pl.CostEstimate(
        flops=2 * B * W * D,
        transcendentals=0,
        bytes_accessed=(B * W * D + B * D) * itemsize + 4 * (W + 1),
    )

    if slab_bytes < (1 << 20) and grid_steps >= 4:
        # Many tiny steps: 3-deep buffering hides per-step DMA issue latency.
        x_spec = pl.BlockSpec((tb, W * D), lambda b: (b, 0),
                              pipeline_mode=pl.Buffered(3))
    else:
        x_spec = pl.BlockSpec((tb, W * D), lambda b: (b, 0))

    # TODO(synk): for very large windows where a single full-W row exceeds the
    # slab budget, add a trailing "arbitrary" W-tiling grid axis with an f32
    # VMEM accumulator scratch (pl.when init/finalize) instead of unrolling.
    out2 = pl.pallas_call(
        functools.partial(ar_kernel, window=W, d=D),
        out_shape=jax.ShapeDtypeStruct((B, D), x.dtype),
        grid_spec=pltpu.PrefetchScalarGridSpec(
            num_scalar_prefetch=0,
            grid=(grid_steps,),
            in_specs=[
                x_spec,
                pl.BlockSpec(memory_space=pltpu.SMEM),   # weight (W,)
                pl.BlockSpec(memory_space=pltpu.SMEM),   # bias (1,)
            ],
            out_specs=pl.BlockSpec((tb, D), lambda b: (b, 0)),
        ),
        compiler_params=pltpu.CompilerParams(
            dimension_semantics=("parallel",),
            vmem_limit_bytes=vmem_limit,
        ),
        cost_estimate=cost,
    )(x2, w_smem, b_smem)

    return out2.reshape(B, 1, D)


if __name__ == "__main__":
    # Small shapes consistent with the module: batch=2, window=8, n_multiv=32
    B, W, D = 2, 8, 32
    key = jax.random.PRNGKey(0)
    kx, kw, kb = jax.random.split(key, 3)

    x = jax.random.normal(kx, (B, W, D), dtype=jnp.float32)
    # nn.Linear(window, 1): weight [1, window], bias [1]
    weight = jax.random.normal(kw, (1, W), dtype=jnp.float32) * 0.1
    bias = jax.random.normal(kb, (1,), dtype=jnp.float32) * 0.1

    out = jax.block_until_ready(ar_forward(x, weight, bias))

    # Pure-JAX reference: transpose -> linear -> transpose
    ref = (jnp.einsum("bwd,w->bd", x, weight[0]) + bias[0])[:, None, :]
    assert out.shape == (B, 1, D), out.shape
    assert jnp.allclose(out, ref, atol=1e-5, rtol=1e-5), (
        float(jnp.max(jnp.abs(out - ref))))

    # Non-divisible batch exercises the padded/masked partial last block.
    B2 = 11
    x_odd = jax.random.normal(kb, (B2, W, D), dtype=jnp.float32)
    out_odd = jax.block_until_ready(ar_forward(x_odd, weight, bias, tb=8))
    ref_odd = (jnp.einsum("bwd,w->bd", x_odd, weight[0]) + bias[0])[:, None, :]
    assert out_odd.shape == (B2, 1, D), out_odd.shape
    assert jnp.allclose(out_odd, ref_odd, atol=1e-5, rtol=1e-5), (
        float(jnp.max(jnp.abs(out_odd - ref_odd))))

    print("KERNEL_OK")
</pallas_src>

<mosaic_0001>
module attributes {stable_mosaic.version = 11 : i64} {
  func.func @ar_kernel(%arg0: i32, %arg1: memref<2x256xf32, #tpu.memory_space<vmem>>, %arg2: memref<8xf32, #tpu.memory_space<smem>>, %arg3: memref<1xf32, #tpu.memory_space<smem>>, %arg4: memref<2x32xf32, #tpu.memory_space<vmem>>) attributes {dimension_semantics = [#tpu.dimension_semantics<parallel>], iteration_bounds = array<i64: 1>, scalar_prefetch = 0 : i64, scratch_operands = 0 : i64, tpu.core_type = #tpu.core_type<tc>, window_params = [{transform_indices = @transform_0, window_bounds = array<i64: 2, 256>}, {transform_indices = @transform_1, window_bounds = array<i64: 8>}, {transform_indices = @transform_2, window_bounds = array<i64: 1>}, {transform_indices = @transform_3, window_bounds = array<i64: 2, 32>}]} {
    %c0 = arith.constant 0 : index
    %c0_0 = arith.constant 0 : index
    %0 = vector.load %arg1[%c0, %c0_0] : memref<2x256xf32, #tpu.memory_space<vmem>>, vector<2x32xf32>
    %c0_1 = arith.constant 0 : index
    %1 = memref.load %arg2[%c0_1] : memref<8xf32, #tpu.memory_space<smem>>
    %2 = vector.broadcast %1 : f32 to vector<2x32xf32>
    %3 = arith.mulf %0, %2 : vector<2x32xf32>
    %c0_2 = arith.constant 0 : index
    %c32 = arith.constant 32 : index
    %4 = vector.load %arg1[%c0_2, %c32] : memref<2x256xf32, #tpu.memory_space<vmem>>, vector<2x32xf32>
    %c1 = arith.constant 1 : index
    %5 = memref.load %arg2[%c1] : memref<8xf32, #tpu.memory_space<smem>>
    %6 = vector.broadcast %5 : f32 to vector<2x32xf32>
    %7 = arith.mulf %4, %6 : vector<2x32xf32>
    %8 = arith.addf %3, %7 : vector<2x32xf32>
    %c0_3 = arith.constant 0 : index
    %c64 = arith.constant 64 : index
    %9 = vector.load %arg1[%c0_3, %c64] : memref<2x256xf32, #tpu.memory_space<vmem>>, vector<2x32xf32>
    %c2 = arith.constant 2 : index
    %10 = memref.load %arg2[%c2] : memref<8xf32, #tpu.memory_space<smem>>
    %11 = vector.broadcast %10 : f32 to vector<2x32xf32>
    %12 = arith.mulf %9, %11 : vector<2x32xf32>
    %13 = arith.addf %8, %12 : vector<2x32xf32>
    %c0_4 = arith.constant 0 : index
    %c96 = arith.constant 96 : index
    %14 = vector.load %arg1[%c0_4, %c96] : memref<2x256xf32, #tpu.memory_space<vmem>>, vector<2x32xf32>
    %c3 = arith.constant 3 : index
    %15 = memref.load %arg2[%c3] : memref<8xf32, #tpu.memory_space<smem>>
    %16 = vector.broadcast %15 : f32 to vector<2x32xf32>
    %17 = arith.mulf %14, %16 : vector<2x32xf32>
    %18 = arith.addf %13, %17 : vector<2x32xf32>
    %c0_5 = arith.constant 0 : index
    %c128 = arith.constant 128 : index
    %19 = vector.load %arg1[%c0_5, %c128] : memref<2x256xf32, #tpu.memory_space<vmem>>, vector<2x32xf32>
    %c4 = arith.constant 4 : index
    %20 = memref.load %arg2[%c4] : memref<8xf32, #tpu.memory_space<smem>>
    %21 = vector.broadcast %20 : f32 to vector<2x32xf32>
    %22 = arith.mulf %19, %21 : vector<2x32xf32>
    %23 = arith.addf %18, %22 : vector<2x32xf32>
    %c0_6 = arith.constant 0 : index
    %c160 = arith.constant 160 : index
    %24 = vector.load %arg1[%c0_6, %c160] : memref<2x256xf32, #tpu.memory_space<vmem>>, vector<2x32xf32>
    %c5 = arith.constant 5 : index
    %25 = memref.load %arg2[%c5] : memref<8xf32, #tpu.memory_space<smem>>
    %26 = vector.broadcast %25 : f32 to vector<2x32xf32>
    %27 = arith.mulf %24, %26 : vector<2x32xf32>
    %28 = arith.addf %23, %27 : vector<2x32xf32>
    %c0_7 = arith.constant 0 : index
    %c192 = arith.constant 192 : index
    %29 = vector.load %arg1[%c0_7, %c192] : memref<2x256xf32, #tpu.memory_space<vmem>>, vector<2x32xf32>
    %c6 = arith.constant 6 : index
    %30 = memref.load %arg2[%c6] : memref<8xf32, #tpu.memory_space<smem>>
    %31 = vector.broadcast %30 : f32 to vector<2x32xf32>
    %32 = arith.mulf %29, %31 : vector<2x32xf32>
    %33 = arith.addf %28, %32 : vector<2x32xf32>
    %c0_8 = arith.constant 0 : index
    %c224 = arith.constant 224 : index
    %34 = vector.load %arg1[%c0_8, %c224] : memref<2x256xf32, #tpu.memory_space<vmem>>, vector<2x32xf32>
    %c7 = arith.constant 7 : index
    %35 = memref.load %arg2[%c7] : memref<8xf32, #tpu.memory_space<smem>>
    %36 = vector.broadcast %35 : f32 to vector<2x32xf32>
    %37 = arith.mulf %34, %36 : vector<2x32xf32>
    %38 = arith.addf %33, %37 : vector<2x32xf32>
    %c0_9 = arith.constant 0 : index
    %39 = memref.load %arg3[%c0_9] : memref<1xf32, #tpu.memory_space<smem>>
    %40 = vector.broadcast %39 : f32 to vector<2x32xf32>
    %41 = arith.addf %38, %40 : vector<2x32xf32>
    %c0_10 = arith.constant 0 : index
    %c0_11 = arith.constant 0 : index
    %42 = vector.load %arg4[%c0_10, %c0_11] : memref<2x32xf32, #tpu.memory_space<vmem>>, vector<2x32xf32>
    tpu.vector_store %arg4[%c0_10, %c0_11], %41 {strides = array<i32>} : memref<2x32xf32, #tpu.memory_space<vmem>>, vector<2x32xf32>,
    return
  }
  func.func @transform_0(%arg0: i32) -> (i32, i32) {
    %c0_i32 = arith.constant 0 : i32
    %c0_i32_0 = arith.constant 0 : i32
    return %arg0, %c0_i32 : i32, i32
  }
  func.func @transform_1(%arg0: i32) -> i32 {
    %c0_i32 = arith.constant 0 : i32
    %c0_i32_0 = arith.constant 0 : i32
    return %c0_i32 : i32
  }
  func.func @transform_2(%arg0: i32) -> i32 {
    %c0_i32 = arith.constant 0 : i32
    %c0_i32_0 = arith.constant 0 : i32
    return %c0_i32 : i32
  }
  func.func @transform_3(%arg0: i32) -> (i32, i32) {
    %c0_i32 = arith.constant 0 : i32
    %c0_i32_0 = arith.constant 0 : i32
    return %arg0, %c0_i32 : i32, i32
  }
}

</mosaic_0001>

<bundles_post_ra>
// kernel: tpu_custom_call.1
= control target key start
LH: loop header
LB: loop body
LE: loop exit
PB: predicated region body
PF: predicated region fallthrough
CT: control target
= control target key end

     0   :  { %9 = vsyncpa [#allocation4], 0  ;;  %s250_s0 = inlined_call_operand.hbm [shape: f32[2,256], index: 0, kind: input, shape index: {}]   ;;  %s251_s1 = inlined_call_operand.vmem [shape: f32[8], index: 1, kind: input, shape index: {}]   ;;  %s252_s2 = inlined_call_operand.<no memory space> [shape: f32[1], index: 2, kind: input, shape index: {}]   ;;  %s253_s3 = inlined_call_operand.hbm [shape: f32[2,32], index: 3, kind: output, shape index: {}]  }
   0x1   :  { %10 = vsyncpa [#allocation6], 0 }
   0x2   :  { %11 = vsyncpa [#allocation5], 0  ;;  %s28_s14 = sshll.u32 %s251_s1, 4  ;;  %s194_s15 = smov [#allocation3]   ;;  %s29_s14 = int_to_ptr.vmem [resolvable:$true] %s28_s14 }
   0x3   :  { %s18_s16 = sshll.u32 %s194_s15, 4  ;;  %s132_s19 = scalar_lea.hbm %s250_s0, 64  ;;  %s19_s16 = int_to_ptr.vmem [resolvable:$true] %s18_s16 }
   0x4   :  { %p133_p0 = scmp.ne.s32.totalorder %s250_s0, %s132_s19  ;;  %p136_p1 = scmp.lt.u32.totalorder %s132_s19, %s250_s0 }
   0x6   :  { %p138_p2 = pnand %p136_p1, %p133_p0 }
   0x8   :  { %141 = shalt.err (!%p138_p2)
}
   0x9   :  { %s142_s24 = scalar_lea.vmem %s19_s16, 64  ;;  %p147_p4 = scmp.lt.s32.totalorder %s19_s16, %s19_s16 }
   0xa   :  { %p143_p3 = scmp.ne.s32.totalorder %s19_s16, %s142_s24  ;;  %p148_p5 = scmp.lt.s32.totalorder %s142_s24, %s142_s24 }
   0xc   :  { %p149_p6 = por %p148_p5, %p147_p4 }
   0xe   :  { %p150_p7 = pnand %p149_p6, %p143_p3 }
  0x10   :  { %153 = shalt.err (!%p150_p7)
}
  0x11   :  { %21 = dma.hbm_to_vmem [thread:$0]  %s250_s0, 64, %s19_s16, [#allocation4]  }
  0x12   :  { %s154_s26 = scalar_lea.vmem %s29_s14, 16  ;;  %p159_p9 = scmp.lt.s32.totalorder %s29_s14, %s29_s14 }
  0x13   :  { %p155_p8 = scmp.ne.s32.totalorder %s29_s14, %s154_s26  ;;  %p160_p10 = scmp.lt.s32.totalorder %s154_s26, %s154_s26 }
  0x15   :  { %p161_p11 = por %p160_p10, %p159_p9 }
  0x17   :  { %p162_p12 = pnand %p161_p11, %p155_p8 }
  0x19   :  { %165 = shalt.err (!%p162_p12)
}
  0x1a   :  { %s195_s27 = smov [#allocation7]  }
  0x1b   :  { %31 = dma.vmem_to_smem %s29_s14, 16, %s195_s27, [#allocation6]  }
  0x1c   :  { %188 = dma.done.wait [#allocation4], 64  }
  0x1d   :  { %189 = vsyncadd [#allocation4], 4294967232 }
  0x1e   :  { %190 = dma.done.wait [#allocation6], 16  }
  0x1f   :  { %191 = vsyncadd [#allocation6], 4294967280 }
  0x20   :  { %40 = sfence }
  0x21   :  { %s119_s28 = sld [smem:[#allocation7 + $0x1]]  ;;  %s120_s29 = sld [smem:[#allocation7 + $0x2]]  ;;  %v41_v0 = vld [vmem:[#allocation3] sm:$0x3]  ;;  %v69_v5 = vld [vmem:[#allocation3 + $0x2] sm:$0x3]  ;;  %v99_v30 = vstv %s252_s2 }
  0x22   :  { %s121_s30 = sld [smem:[#allocation7 + $0x3]]  ;;  %s123_s4 = sld [smem:[#allocation7 + $0x5]]  ;;  %vm101_vm0 = vcmask 254976  }
  0x23   :  { %s124_s5 = sld [smem:[#allocation7 + $0x6]]  ;;  %s125_s0 = sld [smem:[#allocation7 + $0x7]] }
  0x24   :  { %s196_s6 = smov 96   ;;  %s197_s7 = smov 32  }
  0x25   :  { %s198_s8 = smov 64   ;;  %s42_s9 = sld [smem:[#allocation7]] }
  0x26   :  { %s122_s10 = sld [smem:[#allocation7 + $0x4]]  ;;  %s199_s13 = smov [#allocation8]  }
  0x27   :  { %v46_v1 = vstv %s119_s28  ;;  %v54_v3 = vstv %s120_s29  ;;  %s109_s14 = sshll.u32 %s199_s13, 4  ;;  %s110_s14 = int_to_ptr.vmem [resolvable:$true] %s109_s14 }
  0x28   :  { %v47_v2 = vmul.f32 %v46_v1, %v41_v0  ;;  %v62_v4 = vstv %s121_s30  ;;  %v55_v6 = vmul.f32 %v54_v3, %v41_v0  ;;  %v75_v8 = vstv %s123_s4  ;;  %s166_s15 = scalar_lea.vmem %s110_s14, 32  ;;  %p171_p0 = scmp.lt.s32.totalorder %s110_s14, %s110_s14 }
  0x29   :  { %v63_v7 = vmul.f32 %v62_v4, %v41_v0  ;;  %v83_v9 = vstv %s124_s5  ;;  %v76_v10 = vmul.f32 %v75_v8, %v69_v5  ;;  %v91_v11 = vstv %s125_s0  ;;  %p167_p13 = scmp.ne.s32.totalorder %s110_s14, %s166_s15  ;;  %p172_p1 = scmp.lt.s32.totalorder %s166_s15, %s166_s15 }
  0x2a   :  { %49 = vrot.lane.b32.xlu0 %v47_v2, %s196_s6  ;;  %v84_v12 = vmul.f32 %v83_v9, %v69_v5  ;;  %v92_v13 = vmul.f32 %v91_v11, %v69_v5 }
  0x2b   :  { %65 = vrot.lane.b32.xlu1 %v63_v7, %s197_s7  ;;  %v43_v14 = vstv %s42_s9  ;;  %p173_p2 = por %p172_p1, %p171_p0 }
  0x2c   :  { %v44_v15 = vmul.f32 %v43_v14, %v41_v0  ;;  %v71_v18 = vstv %s122_s10 }
  0x2d   :  { %v72_v22 = vmul.f32 %v71_v18, %v69_v5  ;;  %p174_p3 = pnand %p173_p2, %p167_p13 }
  0x2e   :  { %57 = vrot.lane.b32.xlu0 %v55_v6, %s198_s8 }
  0x2f   :  { %78 = vrot.lane.b32.xlu1 %v76_v10, %s196_s6 }
  0x32   :  { %86 = vrot.lane.b32.xlu0 %v84_v12, %s198_s8 }
  0x33   :  { %94 = vrot.lane.b32.xlu1 %v92_v13, %s197_s7 }
  0x9c   :  { %v50_v16 = vpop.permute.xlu0 %49 }
  0x9d   :  { %v66_v17 = vpop.permute.xlu1 %65  ;;  %v52_v19 = vadd.f32 %v50_v16, %v44_v15 }
  0xa0   :  { %v58_v20 = vpop.permute.xlu0 %57 }
  0xa1   :  { %v60_v21 = vadd.f32 %v58_v20, %v52_v19  ;;  %v79_v23 = vpop.permute.xlu1 %78 }
  0xa3   :  { %v68_v24 = vadd.f32 %v66_v17, %v60_v21 }
  0xa4   :  { %v87_v26 = vpop.permute.xlu0 %86 }
  0xa5   :  { %v73_v25 = vadd.f32 %v72_v22, %v68_v24  ;;  %v95_v28 = vpop.permute.xlu1 %94 }
  0xa7   :  { %v81_v27 = vadd.f32 %v79_v23, %v73_v25 }
  0xa9   :  { %v89_v29 = vadd.f32 %v87_v26, %v81_v27 }
  0xab   :  { %v97_v31 = vadd.f32 %v95_v28, %v89_v29 }
  0xad   :  { %v100_v32 = vadd.f32 %v99_v30, %v97_v31 }
  0xaf   :  { %102 = vst.msk [vmem:[#allocation8] sm:$0x3] %vm101_vm0, %v100_v32 }
  0xb0   :  { %177 = shalt.err (!%p174_p3)
}
  0xb1   :  { %s178_s18 = scalar_lea.hbm %s253_s3, 32 }
  0xb2   :  { %p179_p4 = scmp.ne.s32.totalorder %s253_s3, %s178_s18  ;;  %p182_p5 = scmp.lt.u32.totalorder %s178_s18, %s253_s3 }
  0xb4   :  { %p184_p6 = pnand %p182_p5, %p179_p4 }
  0xb6   :  { %187 = shalt.err (!%p184_p6)
}
  0xb7   :  { %112 = dma.vmem_to_hbm [thread:$0]  %s110_s14, 32, %s253_s3, [#allocation5]  }
  0xb8   :  { %192 = dma.done.wait [#allocation5], 32  }
  0xb9   :  { %193 = vsyncadd [#allocation5], 4294967264 }
  0xba   :  { %116 = vsyncpa [#allocation4], 1 }
  0xbb   :  { %117 = vsyncpa [#allocation5], 1 }
  0xbc   :  { %118 = vsyncpa [#allocation6], 1 }

</bundles_post_ra>
